<compile_context>
chip_gen: v6e
topology: v6e:2x2x1
jax: 0.10.0
libtpu: 0.0.40
codegen_flags: <defaults>
</compile_context>

<pallas_src>
import jax
import jax.numpy as jnp
from jax.experimental import pallas as pl
from jax.experimental.pallas import tpu as pltpu


def _attention_gate_kernel(g_ref, x_ref, wgt_ref, wxt_ref, wpsi_ref,
                           bgx_ref, bpsi_ref, out_ref):
    """One (batch, spatial-tile) block of the fused attention gate.

    g_ref:   (F_g,   T)     gating-signal pixels (channels on sublanes, pixels on lanes)
    x_ref:   (F_l,   T)     skip-connection pixels
    wgt_ref: (F_int, F_g)   BN-folded W_g weight (transposed), activation dtype
    wxt_ref: (F_int, F_l)   BN-folded W_x weight (transposed), activation dtype
    wpsi:    (1, F_int)     BN-folded psi weight row (f32)
    bgx:     (F_int, 1)     combined W_g + W_x folded bias (f32)
    bpsi:    (1,) in SMEM   folded psi bias (scalar)
    out:     (F_l,   T)     x * sigmoid(psi(relu(W_g(g) + W_x(x))))
    """
    # 1x1 convs as MXU matmuls. Weights share the activation dtype, so this is a
    # single-pass bf16 MXU op when fed bf16; accumulation is f32.
    g1 = jnp.dot(wgt_ref[...], g_ref[...], preferred_element_type=jnp.float32)
    x1 = jnp.dot(wxt_ref[...], x_ref[...], preferred_element_type=jnp.float32)

    # ReLU with the fused (BN + conv-bias) additive term.
    h = jnp.maximum(g1 + x1 + bgx_ref[...], 0.0)                  # (F_int, T) f32

    # psi: (1, F_int) @ (F_int, T) on the otherwise-idle MXU slot (the VPU
    # multiply + XLU sublane-reduce alternative loads the binding VALU slot).
    p = jnp.dot(wpsi_ref[...], h, preferred_element_type=jnp.float32) + bpsi_ref[0]
    alpha = jax.nn.sigmoid(p).astype(x_ref.dtype)                 # (1, T), cast once

    # Final gating multiply in the activation dtype: no full-tile f32 promote/demote.
    out_ref[...] = x_ref[...] * alpha


def attention_gate_pallas(g, x, params, *, tile_hw=None):
    """g: (B, F_g, H, W), x: (B, F_l, H, W) — NCHW, like the PyTorch module.

    Output dtype follows x.dtype. Feed bf16 g/x to halve HBM traffic (the
    kernel is HBM-bound at typical UNet channel counts); weights follow suit.
    """
    B, F_g, H, W = g.shape
    Bx, F_l, Hx, Wx = x.shape
    assert (B, H, W) == (Bx, Hx, Wx)
    F_int = params["wg"].shape[1]
    HW = H * W

    act_dtype = x.dtype
    # Weight dtype must match the activation dtype: a mixed f32-weight x
    # bf16-activation dot silently promotes to a multi-pass f32 MXU matmul.
    w_dtype = jnp.bfloat16 if act_dtype == jnp.bfloat16 else jnp.float32
    act_b = jnp.dtype(act_dtype).itemsize
    w_b = jnp.dtype(w_dtype).itemsize

    # --- one-time tiny param prep: fold BN scales + conv biases into the
    #     weights; pad F_int up to the sublane-packing granularity (8 for f32,
    #     16 for bf16) with zero rows (zero weight & zero psi weight -> exact
    #     no-op channels). F_g / F_l are not padded here — that would require
    #     an HBM copy of the activations.
    pack = 16 if w_dtype == jnp.bfloat16 else 8
    F_int_p = ((F_int + pack - 1) // pack) * pack

    def pad_rows(a):
        return jnp.pad(a, ((0, F_int_p - F_int),) + ((0, 0),) * (a.ndim - 1))

    wgt = pad_rows((params["wg"] * params["scale_g"][None, :]).T).astype(w_dtype)   # (F_int_p, F_g)
    wxt = pad_rows((params["wx"] * params["scale_x"][None, :]).T).astype(w_dtype)   # (F_int_p, F_l)
    bias_gx = pad_rows(
        (params["bias_g"] + params["bias_x"]).reshape(F_int, 1)).astype(jnp.float32)  # (F_int_p, 1)
    wpsi = pad_rows(
        (params["wpsi"].reshape(F_int) * params["scale_psi"]).reshape(F_int, 1)
    ).reshape(1, F_int_p).astype(jnp.float32)                                          # (1, F_int_p)
    bpsi = params["bias_psi"].reshape(1).astype(jnp.float32)                           # SMEM scalar

    # --- generation-aware spatial tile / VMEM budget.
    hw_128 = pl.cdiv(HW, 128) * 128
    try:
        vmem_cap = int(pltpu.get_tpu_info().vmem_capacity_bytes)
    except Exception:
        vmem_cap = 64 * 2 ** 20
    # ~40 MiB on 64 MiB parts (v7x), up to 80 MiB on 128 MiB parts (v5e/v6e).
    budget = int(min(0.62 * vmem_cap, 80 * 2 ** 20))

    # bytes per spatial lane: double-buffered g/x/out tiles + f32 intermediates.
    per_lane = 2 * (F_g + 2 * F_l) * act_b + 4 * (3 * F_int_p + 8)
    # resident weights/biases — Pallas still allocates them double-buffered.
    fixed = 2 * (w_b * F_int_p * (F_g + F_l) + 4 * (2 * F_int_p + 8)) + (2 << 20)

    t = max(128, (budget - fixed) // per_lane // 128 * 128)
    if tile_hw is not None:
        t = min(t, max(128, tile_hw // 128 * 128))
    t = min(t, 8192, hw_128)
    # Keep >= 2 spatial tiles when B == 1 so both v7x TensorCores (and the
    # v5e/v6e megacore split) get work.
    if B == 1 and hw_128 >= 256:
        t = min(t, max(128, (hw_128 // 2) // 128 * 128))
    if HW <= 128:
        t = HW  # single full-extent block (full-dim rule; avoids over-sized block)

    est = fixed + per_lane * t + (4 << 20)
    vmem_limit = int(min(max(est, 16 * 2 ** 20), int(0.9 * vmem_cap)))

    # Free, contiguous reshapes — no HBM copies, no padding, no output slice.
    g3 = g.reshape(B, F_g, HW)
    x3 = x.reshape(B, F_l, HW)

    grid = (B, pl.cdiv(HW, t))

    out3 = pl.pallas_call(
        _attention_gate_kernel,
        out_shape=jax.ShapeDtypeStruct((B, F_l, HW), act_dtype),
        grid=grid,
        in_specs=[
            pl.BlockSpec((None, F_g, t), lambda b, s: (b, 0, s)),    # g tile (batch squeezed)
            pl.BlockSpec((None, F_l, t), lambda b, s: (b, 0, s)),    # x tile
            pl.BlockSpec((F_int_p, F_g), lambda b, s: (0, 0)),       # wgt (resident)
            pl.BlockSpec((F_int_p, F_l), lambda b, s: (0, 0)),       # wxt (resident)
            pl.BlockSpec((1, F_int_p), lambda b, s: (0, 0)),         # wpsi row
            pl.BlockSpec((F_int_p, 1), lambda b, s: (0, 0)),         # bias_gx column
            pl.BlockSpec(memory_space=pltpu.MemorySpace.SMEM),       # bpsi scalar in SMEM
        ],
        out_specs=pl.BlockSpec((None, F_l, t), lambda b, s: (b, 0, s)),
        compiler_params=pltpu.CompilerParams(
            dimension_semantics=("parallel", "parallel"),
            vmem_limit_bytes=vmem_limit),
    )(g3, x3, wgt, wxt, wpsi, bias_gx, bpsi)

    return out3.reshape(B, F_l, H, W)   # already NCHW — no transpose


def make_params(key, F_g, F_l, F_int, eps=1e-5):
    """Deterministic synthetic parameters; BN (eval mode) + conv bias folded."""
    ks = jax.random.split(key, 12)

    def fold(conv_b, gamma, beta, mean, var):
        scale = gamma / jnp.sqrt(var + eps)
        bias = (conv_b - mean) * scale + beta
        return scale, bias

    # W_g: Conv2d(F_g -> F_int, 1x1) + BN(F_int)
    wg = 0.1 * jax.random.normal(ks[0], (F_g, F_int), jnp.float32)
    bg = 0.05 * jax.random.normal(ks[1], (F_int,), jnp.float32)
    gamma_g = 1.0 + 0.1 * jax.random.normal(ks[2], (F_int,), jnp.float32)
    beta_g = 0.1 * jax.random.normal(ks[3], (F_int,), jnp.float32)
    mean_g = 0.1 * jax.random.normal(ks[4], (F_int,), jnp.float32)
    var_g = 1.0 + 0.1 * jax.random.uniform(ks[5], (F_int,), jnp.float32)
    scale_g, bias_g = fold(bg, gamma_g, beta_g, mean_g, var_g)

    # W_x: Conv2d(F_l -> F_int, 1x1) + BN(F_int)
    wx = 0.1 * jax.random.normal(ks[6], (F_l, F_int), jnp.float32)
    bx = 0.05 * jax.random.normal(ks[7], (F_int,), jnp.float32)
    gamma_x = 1.0 + 0.1 * jax.random.normal(ks[8], (F_int,), jnp.float32)
    beta_x = 0.1 * jax.random.normal(ks[9], (F_int,), jnp.float32)
    mean_x = jnp.zeros((F_int,), jnp.float32)
    var_x = jnp.ones((F_int,), jnp.float32)
    scale_x, bias_x = fold(bx, gamma_x, beta_x, mean_x, var_x)

    # psi: Conv2d(F_int -> 1, 1x1) + BN(1) + Sigmoid
    wpsi = 0.1 * jax.random.normal(ks[10], (F_int, 1), jnp.float32)
    bpsi = 0.05 * jax.random.normal(ks[11], (1,), jnp.float32)
    gamma_p = jnp.ones((1,), jnp.float32)
    beta_p = jnp.zeros((1,), jnp.float32)
    mean_p = jnp.zeros((1,), jnp.float32)
    var_p = jnp.ones((1,), jnp.float32)
    scale_psi, bias_psi = fold(bpsi, gamma_p, beta_p, mean_p, var_p)

    return dict(wg=wg, wx=wx, wpsi=wpsi,
                scale_g=scale_g, bias_g=bias_g,
                scale_x=scale_x, bias_x=bias_x,
                scale_psi=scale_psi, bias_psi=bias_psi)


def attention_gate_ref(g, x, params):
    """Pure-JAX f32 reference with identical semantics (for sanity checking)."""
    B, F_g, H, W = g.shape
    _, F_l, _, _ = x.shape
    gm = jnp.transpose(g, (0, 2, 3, 1)).reshape(-1, F_g)
    xm = jnp.transpose(x, (0, 2, 3, 1)).reshape(-1, F_l)
    g1 = gm @ params["wg"] * params["scale_g"] + params["bias_g"]
    x1 = xm @ params["wx"] * params["scale_x"] + params["bias_x"]
    h = jnp.maximum(g1 + x1, 0.0)
    p = h @ params["wpsi"] * params["scale_psi"] + params["bias_psi"]
    alpha = jax.nn.sigmoid(p)
    om = xm * alpha
    return jnp.transpose(om.reshape(B, H, W, F_l), (0, 3, 1, 2))


if __name__ == "__main__":
    B, F_g, F_l, F_int, H, W = 2, 4, 4, 8, 16, 16

    key = jax.random.PRNGKey(0)
    k_g, k_x, k_p = jax.random.split(key, 3)
    g = jax.random.normal(k_g, (B, F_g, H, W), jnp.float32)
    x = jax.random.normal(k_x, (B, F_l, H, W), jnp.float32)
    params = make_params(k_p, F_g, F_l, F_int)

    ref = attention_gate_ref(g, x, params)

    # f32 path.
    out_f32 = jax.block_until_ready(attention_gate_pallas(g, x, params))
    assert out_f32.shape == (B, F_l, H, W)
    assert jnp.allclose(out_f32, ref, atol=1e-4, rtol=1e-4), "f32 mismatch vs reference"

    # bf16 path: halves HBM traffic on the dominant g/x/out tiles; weights
    # follow the activation dtype so the MXU runs single-pass bf16.
    g_b = g.astype(jnp.bfloat16)
    x_b = x.astype(jnp.bfloat16)
    out_bf16 = jax.block_until_ready(attention_gate_pallas(g_b, x_b, params))
    assert out_bf16.dtype == jnp.bfloat16
    assert jnp.allclose(out_bf16.astype(jnp.float32), ref, atol=5e-2, rtol=5e-2), \
        "bf16 mismatch vs reference"

    print("KERNEL_OK")
</pallas_src>

<mosaic_0001>
module attributes {stable_mosaic.version = 11 : i64} {
  func.func @_attention_gate_kernel(%arg0: i32, %arg1: i32, %arg2: memref<1x4x256xf32, #tpu.memory_space<vmem>>, %arg3: memref<1x4x256xf32, #tpu.memory_space<vmem>>, %arg4: memref<8x4xf32, #tpu.memory_space<vmem>>, %arg5: memref<8x4xf32, #tpu.memory_space<vmem>>, %arg6: memref<1x8xf32, #tpu.memory_space<vmem>>, %arg7: memref<8x1xf32, #tpu.memory_space<vmem>>, %arg8: memref<1xf32, #tpu.memory_space<smem>>, %arg9: memref<1x4x256xf32, #tpu.memory_space<vmem>>) attributes {dimension_semantics = [#tpu.dimension_semantics<parallel>, #tpu.dimension_semantics<parallel>], iteration_bounds = array<i64: 2, 1>, scalar_prefetch = 0 : i64, scratch_operands = 0 : i64, tpu.core_type = #tpu.core_type<tc>, window_params = [{transform_indices = @transform_0, window_bounds = array<i64: 1, 4, 256>}, {transform_indices = @transform_1, window_bounds = array<i64: 1, 4, 256>}, {pipeline_mode = #tpu.pipeline_mode<synchronous>, transform_indices = @transform_2, window_bounds = array<i64: 8, 4>}, {pipeline_mode = #tpu.pipeline_mode<synchronous>, transform_indices = @transform_3, window_bounds = array<i64: 8, 4>}, {pipeline_mode = #tpu.pipeline_mode<synchronous>, transform_indices = @transform_4, window_bounds = array<i64: 1, 8>}, {pipeline_mode = #tpu.pipeline_mode<synchronous>, transform_indices = @transform_5, window_bounds = array<i64: 8, 1>}, {transform_indices = @transform_6, window_bounds = array<i64: 1>}, {transform_indices = @transform_7, window_bounds = array<i64: 1, 4, 256>}]} {
    %c0 = arith.constant 0 : index
    %c0_0 = arith.constant 0 : index
    %0 = vector.load %arg4[%c0, %c0_0] : memref<8x4xf32, #tpu.memory_space<vmem>>, vector<8x4xf32>
    %c0_1 = arith.constant 0 : index
    %c0_2 = arith.constant 0 : index
    %c0_3 = arith.constant 0 : index
    %1 = vector.load %arg2[%c0_1, %c0_2, %c0_3] : memref<1x4x256xf32, #tpu.memory_space<vmem>>, vector<1x4x256xf32>
    %2 = vector.shape_cast %1 : vector<1x4x256xf32> to vector<4x256xf32>
    %cst = arith.constant dense<0.000000e+00> : vector<8x256xf32>
    %3 = tpu.matmul %0, %2, %cst {dimension_numbers = #tpu.dot_dimension_numbers<[1], [0], [0], [1], [0, 0, 1, 1], [], []>} : vector<8x4xf32>, vector<4x256xf32>, vector<8x256xf32> -> vector<8x256xf32>
    %c0_4 = arith.constant 0 : index
    %c0_5 = arith.constant 0 : index
    %4 = vector.load %arg5[%c0_4, %c0_5] : memref<8x4xf32, #tpu.memory_space<vmem>>, vector<8x4xf32>
    %c0_6 = arith.constant 0 : index
    %c0_7 = arith.constant 0 : index
    %c0_8 = arith.constant 0 : index
    %5 = vector.load %arg3[%c0_6, %c0_7, %c0_8] : memref<1x4x256xf32, #tpu.memory_space<vmem>>, vector<1x4x256xf32>
    %6 = vector.shape_cast %5 : vector<1x4x256xf32> to vector<4x256xf32>
    %cst_9 = arith.constant dense<0.000000e+00> : vector<8x256xf32>
    %7 = tpu.matmul %4, %6, %cst_9 {dimension_numbers = #tpu.dot_dimension_numbers<[1], [0], [0], [1], [0, 0, 1, 1], [], []>} : vector<8x4xf32>, vector<4x256xf32>, vector<8x256xf32> -> vector<8x256xf32>
    %8 = arith.addf %3, %7 : vector<8x256xf32>
    %c0_10 = arith.constant 0 : index
    %c0_11 = arith.constant 0 : index
    %9 = vector.load %arg7[%c0_10, %c0_11] : memref<8x1xf32, #tpu.memory_space<vmem>>, vector<8x1xf32>
    %10 = vector.broadcast %9 : vector<8x1xf32> to vector<8x256xf32>
    %11 = arith.addf %8, %10 : vector<8x256xf32>
    %cst_12 = arith.constant 0.000000e+00 : f32
    %12 = vector.broadcast %cst_12 : f32 to vector<8x256xf32>
    %13 = arith.maximumf %11, %12 : vector<8x256xf32>
    %c0_13 = arith.constant 0 : index
    %c0_14 = arith.constant 0 : index
    %14 = vector.load %arg6[%c0_13, %c0_14] : memref<1x8xf32, #tpu.memory_space<vmem>>, vector<1x8xf32>
    %cst_15 = arith.constant dense<0.000000e+00> : vector<1x256xf32>
    %15 = tpu.matmul %14, %13, %cst_15 {dimension_numbers = #tpu.dot_dimension_numbers<[1], [0], [0], [1], [0, 0, 1, 1], [], []>} : vector<1x8xf32>, vector<8x256xf32>, vector<1x256xf32> -> vector<1x256xf32>
    %c0_16 = arith.constant 0 : index
    %16 = memref.load %arg8[%c0_16] : memref<1xf32, #tpu.memory_space<smem>>
    %17 = vector.broadcast %16 : f32 to vector<1x256xf32>
    %18 = arith.addf %15, %17 : vector<1x256xf32>
    %19 = arith.negf %18 : vector<1x256xf32>
    %20 = math.exp %19 : vector<1x256xf32>
    %cst_17 = arith.constant 1.000000e+00 : f32
    %21 = vector.broadcast %cst_17 : f32 to vector<1x256xf32>
    %22 = arith.addf %21, %20 : vector<1x256xf32>
    %23 = arith.divf %21, %22 : vector<1x256xf32>
    %c0_18 = arith.constant 0 : index
    %c0_19 = arith.constant 0 : index
    %c0_20 = arith.constant 0 : index
    %24 = vector.load %arg3[%c0_18, %c0_19, %c0_20] : memref<1x4x256xf32, #tpu.memory_space<vmem>>, vector<1x4x256xf32>
    %25 = vector.shape_cast %24 : vector<1x4x256xf32> to vector<4x256xf32>
    %26 = vector.broadcast %23 : vector<1x256xf32> to vector<4x256xf32>
    %27 = arith.mulf %25, %26 : vector<4x256xf32>
    %c0_21 = arith.constant 0 : index
    %c0_22 = arith.constant 0 : index
    %c0_23 = arith.constant 0 : index
    %28 = vector.load %arg9[%c0_21, %c0_22, %c0_23] : memref<1x4x256xf32, #tpu.memory_space<vmem>>, vector<1x4x256xf32>
    %29 = vector.shape_cast %28 : vector<1x4x256xf32> to vector<4x256xf32>
    %30 = vector.shape_cast %27 : vector<4x256xf32> to vector<1x4x256xf32>
    tpu.vector_store %arg9[%c0_21, %c0_22, %c0_23], %30 {strides = array<i32>} : memref<1x4x256xf32, #tpu.memory_space<vmem>>, vector<1x4x256xf32>,
    return
  }
  func.func @transform_0(%arg0: i32, %arg1: i32) -> (i32, i32, i32) {
    %c0_i32 = arith.constant 0 : i32
    %c0_i32_0 = arith.constant 0 : i32
    return %arg0, %c0_i32, %arg1 : i32, i32, i32
  }
  func.func @transform_1(%arg0: i32, %arg1: i32) -> (i32, i32, i32) {
    %c0_i32 = arith.constant 0 : i32
    %c0_i32_0 = arith.constant 0 : i32
    return %arg0, %c0_i32, %arg1 : i32, i32, i32
  }
  func.func @transform_2(%arg0: i32, %arg1: i32) -> (i32, i32) {
    %c0_i32 = arith.constant 0 : i32
    %c0_i32_0 = arith.constant 0 : i32
    %c0_i32_1 = arith.constant 0 : i32
    return %c0_i32, %c0_i32_0 : i32, i32
  }
  func.func @transform_3(%arg0: i32, %arg1: i32) -> (i32, i32) {
    %c0_i32 = arith.constant 0 : i32
    %c0_i32_0 = arith.constant 0 : i32
    %c0_i32_1 = arith.constant 0 : i32
    return %c0_i32, %c0_i32_0 : i32, i32
  }
  func.func @transform_4(%arg0: i32, %arg1: i32) -> (i32, i32) {
    %c0_i32 = arith.constant 0 : i32
    %c0_i32_0 = arith.constant 0 : i32
    %c0_i32_1 = arith.constant 0 : i32
    return %c0_i32, %c0_i32_0 : i32, i32
  }
  func.func @transform_5(%arg0: i32, %arg1: i32) -> (i32, i32) {
    %c0_i32 = arith.constant 0 : i32
    %c0_i32_0 = arith.constant 0 : i32
    %c0_i32_1 = arith.constant 0 : i32
    return %c0_i32, %c0_i32_0 : i32, i32
  }
  func.func @transform_6(%arg0: i32, %arg1: i32) -> i32 {
    %c0_i32 = arith.constant 0 : i32
    %c0_i32_0 = arith.constant 0 : i32
    return %c0_i32 : i32
  }
  func.func @transform_7(%arg0: i32, %arg1: i32) -> (i32, i32, i32) {
    %c0_i32 = arith.constant 0 : i32
    %c0_i32_0 = arith.constant 0 : i32
    return %arg0, %c0_i32, %arg1 : i32, i32, i32
  }
}

</mosaic_0001>

<bundles_post_ra>
// kernel: tpu_custom_call.1
= control target key start
LH: loop header
LB: loop body
LE: loop exit
PB: predicated region body
PF: predicated region fallthrough
CT: control target
= control target key end

     0   :  { %s1069_s0 = inlined_call_operand.vmem [shape: f32[2,4,256], index: 0, kind: input, shape index: {}]   ;;  %s1070_s1 = inlined_call_operand.vmem [shape: f32[2,4,256], index: 1, kind: input, shape index: {}]   ;;  %s1071_s2 = inlined_call_operand.vmem [shape: f32[8,4], index: 2, kind: input, shape index: {}]   ;;  %s1072_s3 = inlined_call_operand.vmem [shape: f32[8,4], index: 3, kind: input, shape index: {}]   ;;  %s1073_s4 = inlined_call_operand.vmem [shape: f32[1,8], index: 4, kind: input, shape index: {}]   ;;  %s1074_s5 = inlined_call_operand.vmem [shape: f32[8,1], index: 5, kind: input, shape index: {}]   ;;  %s1075_s6 = inlined_call_operand.<no memory space> [shape: f32[1], index: 6, kind: input, shape index: {}]   ;;  %s1076_s7 = inlined_call_operand.hbm [shape: f32[2,4,256], index: 7, kind: output, shape index: {}]  }
   0x1   :  { %12 = sst [smem:[#allocation2]] %s1075_s6 }
   0x2   :  { %13 = vsyncpa [#allocation4], 0 }
   0x3   :  { %15 = vsyncpa [#allocation4 + $0x1], 0  ;;  %s955_s26 = smov 0   ;;  %s957_s27 = smov 0  }
   0x4   :  { %s959_s28 = smov 0   ;;  %s961_s29 = smov 0  }
   0x5   :  { %s963_s30 = smov 0   ;;  %s965_s8 = smov 0  }
   0x6 LB: > { %s736_s6 = sadd.s32 4294967295, %s907_s8   ;;  %s737_s9 = sadd.s32 4294967294, %s907_s8   ;;  %s907_s8 = sphi %s965_s8, %s21_s8   ;;  %s903_s30 = sphi %s963_s30, %s1083_s30   ;;  %s899_s29 = sphi %s961_s29, %s1082_s29   ;;  %s895_s28 = sphi %s959_s28, %s1081_s28   ;;  %s891_s27 = sphi %s957_s27, %s1080_s27   ;;  %s887_s26 = sphi %s955_s26, %s1079_s26  }
   0x7   : > { %s33_s10 = sadd.s32 1, %s903_s30  ;;  %s203_s11 = sadd.s32 1, %s895_s28 }
   0x8   : > { %p35_p0 = scmp.ge.s32.totalorder %s33_s10, 2  ;;  %p213_p1 = scmp.ne.s32.totalorder %s895_s28, %s891_s27 }
   0x9   : > { %p214_p2 = scmp.eq.s32.totalorder %s736_s6, 1  ;;  %p219_p3 = scmp.ne.s32.totalorder %s891_s27, %s887_s26 }
   0xa   : > { %s1085_s10 = smov (%p35_p0, %s33_s10), 0  ;;  %p220_p5 = scmp.eq.s32.totalorder %s737_s9, 1 }
   0xb   : > { %p995_p4 = por %p214_p2, %p213_p1  ;;  %s198_s13 = ssub.s32 %s903_s30, %s1085_s10 }
   0xc   : > { %p740_p6 = scmp.ge.s32.totalorder %s907_s8, 1  ;;  %p201_p7 = scmp.eq.s32.totalorder %s198_s13, 0 }
   0xd   : > { %p1002_p8 = por %p220_p5, %p219_p3  ;;  %p279_p9 = scmp.lt.s32.totalorder %s907_s8, 3 }
   0xe   : > { %s1008_s15 = scalar_select %p201_p7, %s895_s28, %s203_s11  }
   0xf   : > { %p280_p10 = pnand %p740_p6, %p279_p9 }
  0x10   : > { %p325_p11 = scmp.lt.s32.totalorder (!%p280_p10), %s899_s29, 1  ;;  %s762_s21 = sshll.u32 (!%p280_p10), %s899_s29, 7 }
  0x11   : > { %283 = sbr.rel (%p280_p10) target bundleno = 483 (0x1e3), region = 48  ;;  %s640_s6 = scalar_lea.hbm (!%p280_p10), %s1076_s7, %s762_s21 }
  0x12   : > { %s911_s13 = smov (!%p280_p10), [#allocation3]  }
  0x13   : > { %s835_s16 = sshll.u32 (!%p280_p10), %s911_s13, 4  ;;  %s836_s16 = int_to_ptr.vmem [resolvable:$false] %s835_s16 }
  0x16   : > { %v909_v0 = vmov 0.0   ;;  %v511_v1 = vld [vmem:[%s1074_s5] sm:$0xff]  ;;  %s326_s18 = scalar_select %p325_p11, %s899_s29, 1  ;;  %v910_v2 = vmov 0   ;;  %vm355_vm0 = vcmask 1043456   ;;  %vm351_vm1 = vcmask 31744  }
  0x17   : > { %424 = vmatprep.mubr.f32.mxu0 %v909_v0  ;;  %504 = vmatprep.mubr.f32.mxu1 %v909_v0  ;;  %v347_v7 = vld [vmem:[%s1072_s3] sm:$0xff]  ;;  %vm524_vm2 = vcmask 64512   ;;  %v611_v32 = vlaneseq  ;;  %s837_s29 = scalar_lea.vmem %s836_s16, 256 }
  0x18   : > { %820 = vset.pattern.permute.xlu0 %v910_v2  ;;  %s760_s19 = sshll.u32 %s326_s18, 3  ;;  %v345_v8 = vld [vmem:[%s1071_s2] sm:$0xff]  ;;  %s522_s18 = sld [smem:[#allocation2]] }
  0x19   : > { %514 = vperm.xlu0 %820, %v511_v1   ;;  %s342_s22 = scalar_lea.vmem %s1070_s1, %s760_s19  ;;  %s332_s25 = scalar_lea.vmem %s1069_s0, %s760_s19  ;;  %v521_v20 = vld [vmem:[%s1073_s4] sm:$0x1]  ;;  %v612_v33 = vshrl.u32 %v611_v32, 7 }
  0x1a   : > { %v348_v3 = vld [vmem:[%s342_s22] sm:$0xff]  ;;  %s321_s19 = sand.u32 1, %s891_s27  }
  0x1b   : > { %v346_v4 = vld [vmem:[%s332_s25] sm:$0xff]  ;;  %v350_v5 = vcombine.high %v348_v3, %v348_v3  ;;  %s741_s20 = sshll.u32 %s321_s19, 3  ;;  %v613_v34 = vsub.s32 0, %v612_v33  ;;  %s626_s9 = scalar_lea.sflag [#allocation4], %s321_s19 }
  0x1c   : > { %v432_v6 = vcombine.high %v346_v4, %v346_v4  ;;  %s323_s22 = scalar_lea.vmem [#allocation3], %s741_s20 }
  0x1d   : > { %746 = vmatprep.subr.msk.mxu0 %vm355_vm0, %v350_v5  ;;  %s642_s23 = sshll.u32 %s323_s22, 4  ;;  %s643_s23 = int_to_ptr.vmem [resolvable:$true] %s642_s23 }
  0x1e   : > { %749 = vmatprep.subr.msk.mxu1 %vm355_vm0, %v432_v6  ;;  %747 = vmatpush1.msk.msra.mxu0 %vm355_vm0, %v348_v3  ;;  %v523_v21 = vstv %s522_s18  ;;  %s831_s11 = scalar_lea.vmem %s643_s23, 128  ;;  %p838_p1 = scmp.lt.s32.totalorder %s643_s23, %s836_s16 }
  0x1f   : > { %750 = vmatpush1.msk.msra.mxu1 %vm355_vm0, %v346_v4  ;;  %748 = vmatmul.mubr.msk.f32.vlgmr.msra.gmra.mxu0 %vm351_vm1, %v347_v7  ;;  %p832_p12 = scmp.ne.s32.totalorder %s643_s23, %s831_s11  ;;  %p839_p2 = scmp.lt.s32.totalorder %s837_s29, %s831_s11 }
  0x20   : > { %751 = vmatmul.mubr.msk.f32.vlgmr.msra.gmra.mxu1 %vm351_vm1, %v345_v8  ;;  %592 = vmatprep.mubr.f32.mxu0 %v909_v0 }
  0x21   : > { %p833_p13 = pnand %p832_p12, %p995_p4  ;;  %p840_p3 = por %p839_p2, %p838_p1 }
  0x23   : > { %p834_p0 = pneg %p833_p13 }
  0x25   : > { %p841_p5 = pnand %p840_p3, %p834_p0 }
  0x94   : > { %v515_v12 = vpop.permute.xlu0 %514 }
  0xdf   : > { %v426_v9 = vpop.f32.mrf.mxu0 }
  0xe0   : > { %v506_v10 = vpop.f32.mrf.mxu1 }
  0xe1   : > { %v507_v11 = vadd.f32 %v506_v10, %v426_v9  ;;  %v428_v13 = vpop.f32.mrf.mxu0 }
  0xe2   : > { %v508_v14 = vpop.f32.mrf.mxu1 }
  0xe3   : > { %v509_v15 = vadd.f32 %v508_v14, %v428_v13  ;;  %v517_v16 = vadd.f32 %v515_v12, %v507_v11 }
  0xe5   : > { %v518_v17 = vadd.f32 %v515_v12, %v509_v15  ;;  %v519_v19 = vmax.f32 %v517_v16, 0.0 }
  0xe7   : > { %v520_v18 = vmax.f32 %v518_v17, 0.0 }
  0xe9   : > { %558 = vmatprep.subr.mxu0 %v520_v18 }
  0xea   : > { %559 = vmatpush1.msra.mxu0 %v519_v19 }
  0xeb   : > { %752 = vmatmul.mubr.msk.f32.vlgmr.msra.gmra.mxu0 %vm524_vm2, %v521_v20 }
 0x1ab   : > { %v594_v22 = vpop.f32.mrf.mxu0 }
 0x1ac   : > { %v595_v23 = vadd.f32 %v594_v22, %v523_v21 }
 0x1ad   : > { %v596_v24 = vpop.f32.mrf.mxu0 }
 0x1ae   : > { %v753_v25 = vmul.f32 -1.442695, %v595_v23  ;;  %v597_v26 = vadd.f32 %v596_v24, %v523_v21 }
 0x1b0   : > { %823 = vpow2.f32 %v753_v25  ;;  %v754_v27 = vmul.f32 -1.442695, %v597_v26 }
 0x1b2   : > { %825 = vpow2.f32 %v754_v27 }
 0x1bd   : > { %v824_v28 = vpop.eup %823 }
 0x1be   : > { %v605_v29 = vadd.f32 1.0, %v824_v28 }
 0x1bf   : > { %v826_v30 = vpop.eup %825 }
 0x1c0   : > { %827 = vrcp.f32 %v605_v29  ;;  %v606_v31 = vadd.f32 1.0, %v826_v30 }
 0x1c2   : > { %829 = vrcp.f32 %v606_v31 }
 0x1cd   : > { %v828_v35 = vpop.eup %827 }
 0x1ce   : > { %v614_v37 = vrot.slane %v828_v35, %v613_v34 }
 0x1cf   : > { %v830_v36 = vpop.eup %829 }
 0x1d0   : > { %v618_v38 = vrot.slane %v830_v36, %v613_v34 }
 0x1d2   : > { %v621_v39 = vcombine.low %v614_v37, %v618_v38 }
 0x1d4   : > { %v623_v40 = vmul.f32 %v621_v39, %v348_v3 }
 0x1d6   : > { %624 = vst [vmem:[%s323_s22] sm:$0xff] %v623_v40 }
 0x1d7   : > { %844 = shalt.err (!%p841_p5)
}
 0x1d8   : > { %s845_s17 = scalar_lea.hbm %s640_s6, 128  ;;  %s849_s20 = scalar_lea.hbm %s1076_s7, 256 }
 0x1d9   : > { %p846_p6 = scmp.ne.s32.totalorder %s640_s6, %s845_s17  ;;  %p850_p10 = scmp.lt.s32.totalorder %s640_s6, %s1076_s7 }
 0x1da   : > { %p851_p11 = scmp.lt.s32.totalorder %s849_s20, %s845_s17 }
 0x1db   : > { %p847_p7 = pnand %p846_p6, %p995_p4 }
 0x1dc   : > { %p852_p12 = por %p851_p11, %p850_p10 }
 0x1dd   : > { %p848_p9 = pneg %p847_p7 }
 0x1df   : > { %p853_p13 = pnand %p852_p12, %p848_p9 }
 0x1e1   : > { %856 = shalt.err (!%p853_p13)
}
 0x1e2   : > { %763 = dma.vmem_to_hbm [thread:$0]  (%p995_p4), %s643_s23, 128, %s640_s6, %s626_s9  }
 0x1e3 PF: > { %p769_p0 = scmp.ge.s32.totalorder %s907_s8, 2  ;;  %s654_s24 = sand.u32 1, %s887_s26  }
 0x1e4   : > { %s655_s25 = scalar_lea.sflag [#allocation4], %s654_s24 }
 0x1e5   : > { %p766_p1 = pnand %p769_p0, %p1002_p8 }
 0x1e7   : > { %p767_p2 = pneg %p766_p1 }
 0x1e9   : > { %882 = dma.done.wait (%p767_p2), %s655_s25, 128  }
 0x1ea   : > { %884 = vsyncadd (%p767_p2), %s655_s25, 4294967168  ;;  %s21_s8 = sadd.s32 1, %s907_s8   ;;  %s1079_s26 = smov %s891_s27 }
 0x1eb   : > { %p18_p3 = scmp.ge.s32.totalorder %s21_s8, 4   ;;  %s1080_s27 = smov %s895_s28 }
 0x1ec   : > { %s1081_s28 = smov %s1008_s15  ;;  %s1082_s29 = smov %s903_s30 }
 0x1ed   : > { %s1083_s30 = smov %s1085_s10  ;;  %20 = sbr.rel (!%p18_p3) target bundleno = 6 (0x6), region = 86 }
 0x1f2   :  { %660 = vsyncpa [#allocation4], 1 }
 0x1f3   :  { %662 = vsyncpa [#allocation4 + $0x1], 1 }

</bundles_post_ra>
